<compile_context>
chip_gen: v5e
topology: v5e:2x2
jax: 0.10.0
libtpu: 0.0.40
codegen_flags: <defaults>
</compile_context>

<pallas_src>
import jax
import jax.numpy as jnp
import numpy as np
from jax.experimental import pallas as pl
from jax.experimental.pallas import tpu as pltpu

MARGIN = 0.1
NORM_EPS = 1e-12        # F.normalize clamps the norm at eps (clamp, not norm+eps)
OUT_LANES = 128         # lane-dense epilogue output (avoids masked vst)


# --------------------------------------------------------------------------- #
# Kernel
# --------------------------------------------------------------------------- #
def _siamese_kernel(a_ref, p_ref, n_ref, wt_ref, b_ref, out_ref,
                    acc_a, acc_p, acc_n):
    s = pl.program_id(1)

    @pl.when(s == 0)
    def _init():
        neg_inf = jnp.full(acc_a.shape, -jnp.inf, dtype=jnp.float32)
        acc_a[...] = neg_inf
        acc_p[...] = neg_inf
        acc_n[...] = neg_inf

    w = wt_ref[...]                                          # (Hp, Hp) bf16, VMEM-resident

    def _accumulate(e_ref, acc_ref):
        e = e_ref[...]                                       # (TB, TS, Hp) bf16
        tb, ts, hp = e.shape
        # Flatten (TB, TS) -> M so the MXU sees a large M tile; f32 accumulation.
        z = jnp.dot(e.reshape(tb * ts, hp), w,
                    preferred_element_type=jnp.float32)      # (TB*TS, Hp) f32
        z = z.reshape(tb, ts, hp)
        acc_ref[...] = jnp.maximum(acc_ref[...], jnp.max(z, axis=1))

    _accumulate(a_ref, acc_a)
    _accumulate(p_ref, acc_p)
    _accumulate(n_ref, acc_n)

    @pl.when(s == pl.num_programs(1) - 1)
    def _finalize():
        bias = b_ref[...]                                    # (1, Hp) f32
        # bias is constant over the sequence, so add it after the max.
        va = acc_a[...] + bias
        vp = acc_p[...] + bias
        vn = acc_n[...] + bias

        def _l2_normalize(v):
            sq = jnp.sum(v * v, axis=-1, keepdims=True)
            # F.normalize: v / max(||v||, eps) == v * rsqrt(max(||v||^2, eps^2))  (EUP rsqrt)
            return v * jax.lax.rsqrt(jnp.maximum(sq, NORM_EPS * NORM_EPS))

        ua = _l2_normalize(va)
        up = _l2_normalize(vp)
        un = _l2_normalize(vn)

        d_ap = 1.0 - jnp.sum(ua * up, axis=-1, keepdims=True)   # (TB, 1)
        d_an = 1.0 - jnp.sum(ua * un, axis=-1, keepdims=True)
        pred = (d_an > d_ap).astype(jnp.float32)
        loss = jnp.maximum(d_ap - d_an + MARGIN, 0.0)

        lane = jax.lax.broadcasted_iota(jnp.int32, out_ref.shape, 1)
        packed = jnp.where(lane == 0, d_ap, 0.0)
        packed = jnp.where(lane == 1, d_an, packed)
        packed = jnp.where(lane == 2, pred, packed)
        packed = jnp.where(lane == 3, loss, packed)
        out_ref[...] = packed


# --------------------------------------------------------------------------- #
# Wrapper
# --------------------------------------------------------------------------- #
def _round_up(x, m):
    return ((x + m - 1) // m) * m


def _pick_tile(n, candidates):
    for c in candidates:
        if n % c == 0:
            return c
    return n  # full extent (allowed: block dim equals the full array dim)


def _pick_tiles(bp, s, hp, vmem_budget_bytes=24 * 1024 * 1024):
    """Choose (TB, TS) so the live VMEM set (3 double-buffered bf16 inputs +
    3 f32 accumulators + resident weight + output block) stays within a budget
    that is safe on v5e/v6e (32 MiB scoped default) and v7x (64 MiB physical)."""
    tb = _pick_tile(bp, (128, 64, 32, 16, 8))
    ts = _pick_tile(s, (64, 32, 16, 8))

    def live_bytes(tb_, ts_):
        inputs = 3 * 2 * tb_ * ts_ * hp * 2          # bf16, double-buffered
        accs = 3 * tb_ * hp * 4
        weight = hp * hp * 2 + hp * 4
        out = 2 * tb_ * OUT_LANES * 4
        return inputs + accs + weight + out

    while live_bytes(tb, ts) > vmem_budget_bytes and ts % 16 == 0:
        ts //= 2
    while live_bytes(tb, ts) > vmem_budget_bytes and tb % 16 == 0:
        tb //= 2
    return tb, ts


def siamese_pallas_call(a_emb, p_emb, n_emb, w_t, bias):
    """a_emb/p_emb/n_emb: (B, S, H) f32 token embeddings.
    w_t: (H_in, H_out) pre-transposed nn.Linear weight.  bias: (H_out,).
    Returns per-row (d_ap, d_an, pred[int32], relu(triplet))."""
    B, S, H = a_emb.shape
    Hp = _round_up(H, 128)
    Bp = _round_up(B, 8)

    def pad_emb(e):
        e = jnp.pad(e, ((0, Bp - B), (0, 0), (0, Hp - H)))
        return e.astype(jnp.bfloat16)

    a_p, p_p, n_p = pad_emb(a_emb), pad_emb(p_emb), pad_emb(n_emb)
    w_p = jnp.pad(w_t, ((0, Hp - H), (0, Hp - H))).astype(jnp.bfloat16)
    b_p = jnp.pad(bias.reshape(1, -1).astype(jnp.float32), ((0, 0), (0, Hp - H)))

    TB, TS = _pick_tiles(Bp, S, Hp)
    grid = (Bp // TB, S // TS)                       # seq reduction axis last

    emb_spec = pl.BlockSpec((TB, TS, Hp), lambda i, s: (i, s, 0))
    out = pl.pallas_call(
        _siamese_kernel,
        out_shape=jax.ShapeDtypeStruct((Bp, OUT_LANES), jnp.float32),
        grid_spec=pltpu.PrefetchScalarGridSpec(
            num_scalar_prefetch=0,
            grid=grid,
            in_specs=[
                emb_spec,                                        # anchor
                emb_spec,                                        # positive
                emb_spec,                                        # negative
                pl.BlockSpec((Hp, Hp), lambda i, s: (0, 0)),     # weight (resident)
                pl.BlockSpec((1, Hp), lambda i, s: (0, 0)),      # bias   (resident)
            ],
            out_specs=pl.BlockSpec((TB, OUT_LANES), lambda i, s: (i, 0)),
            scratch_shapes=[pltpu.VMEM((TB, Hp), jnp.float32)] * 3,
        ),
        compiler_params=pltpu.CompilerParams(
            dimension_semantics=("parallel", "arbitrary")),
    )(a_p, p_p, n_p, w_p, b_p)

    d_ap = out[:B, 0]
    d_an = out[:B, 1]
    pred = out[:B, 2].astype(jnp.int32)
    loss_row = out[:B, 3]
    return d_ap, d_an, pred, loss_row


def siamese_forward(emb_table, weight, bias, a_ids, p_ids, n_ids, target=None):
    """Mirrors SiameseNetwork.forward: mean triplet loss if `target` is given,
    otherwise per-row 0/1 predictions (1 iff d(a,n) > d(a,p))."""
    a_emb = emb_table[a_ids]        # nn.Embedding gather (padding row 0 is zero)
    p_emb = emb_table[p_ids]
    n_emb = emb_table[n_ids]
    d_ap, d_an, pred, loss_row = siamese_pallas_call(
        a_emb, p_emb, n_emb, weight.T, bias)
    if target is not None:
        return jnp.mean(loss_row)
    return pred


# --------------------------------------------------------------------------- #
# Demo / self-check
# --------------------------------------------------------------------------- #
if __name__ == "__main__":
    B, S, H, V = 4, 24, 32, 30                 # batch, max_length, hidden_size, vocab_size
    key = jax.random.PRNGKey(0)
    k_emb, k_w, k_b, k_a, k_p, k_n = jax.random.split(key, 6)

    emb_table = jax.random.normal(k_emb, (V + 1, H), jnp.float32)
    emb_table = emb_table.at[0].set(0.0)       # padding_idx=0
    weight = jax.random.normal(k_w, (H, H), jnp.float32) / np.sqrt(H)
    bias = jax.random.normal(k_b, (H,), jnp.float32) * 0.1

    a_ids = jax.random.randint(k_a, (B, S), 0, V + 1)
    p_ids = jax.random.randint(k_p, (B, S), 0, V + 1)
    n_ids = jax.random.randint(k_n, (B, S), 0, V + 1)

    # Pallas forward, both modes of SiameseNetwork.forward
    preds = jax.block_until_ready(
        siamese_forward(emb_table, weight, bias, a_ids, p_ids, n_ids))
    loss = jax.block_until_ready(
        siamese_forward(emb_table, weight, bias, a_ids, p_ids, n_ids, target=True))

    # Pure-JAX f32 reference
    def encode_ref(ids):
        e = emb_table[ids]
        z = e @ weight.T + bias
        return z.max(axis=1)

    def l2n(v):
        nrm = jnp.linalg.norm(v, axis=-1, keepdims=True)
        return v / jnp.maximum(nrm, NORM_EPS)

    va, vp, vn = encode_ref(a_ids), encode_ref(p_ids), encode_ref(n_ids)
    ua, up, un = l2n(va), l2n(vp), l2n(vn)
    d_ap_ref = 1.0 - jnp.sum(ua * up, axis=-1)
    d_an_ref = 1.0 - jnp.sum(ua * un, axis=-1)
    pred_ref = (d_an_ref > d_ap_ref).astype(jnp.int32)
    loss_ref = jnp.mean(jnp.maximum(d_ap_ref - d_an_ref + MARGIN, 0.0))

    d_ap_k, d_an_k, pred_k, _ = siamese_pallas_call(
        emb_table[a_ids], emb_table[p_ids], emb_table[n_ids], weight.T, bias)
    d_ap_k = jax.block_until_ready(d_ap_k)

    np.testing.assert_allclose(np.asarray(d_ap_k), np.asarray(d_ap_ref), atol=3e-2)
    np.testing.assert_allclose(np.asarray(d_an_k), np.asarray(d_an_ref), atol=3e-2)
    np.testing.assert_allclose(float(loss), float(loss_ref), atol=3e-2)
    # predictions must match wherever the two distances are not nearly tied (bf16 tol)
    clear_gap = np.abs(np.asarray(d_an_ref - d_ap_ref)) > 0.1
    assert np.all((np.asarray(pred_k) == np.asarray(pred_ref)) | ~clear_gap)
    assert np.all((np.asarray(preds) == np.asarray(pred_ref)) | ~clear_gap)

    print("KERNEL_OK")
</pallas_src>

<mosaic_0001>
module attributes {stable_mosaic.version = 11 : i64} {
  func.func @_siamese_kernel(%arg0: i32, %arg1: i32, %arg2: memref<8x8x128xbf16, #tpu.memory_space<vmem>>, %arg3: memref<8x8x128xbf16, #tpu.memory_space<vmem>>, %arg4: memref<8x8x128xbf16, #tpu.memory_space<vmem>>, %arg5: memref<128x128xbf16, #tpu.memory_space<vmem>>, %arg6: memref<1x128xf32, #tpu.memory_space<vmem>>, %arg7: memref<8x128xf32, #tpu.memory_space<vmem>>, %arg8: memref<8x128xf32, #tpu.memory_space<vmem>>, %arg9: memref<8x128xf32, #tpu.memory_space<vmem>>, %arg10: memref<8x128xf32, #tpu.memory_space<vmem>>) attributes {dimension_semantics = [#tpu.dimension_semantics<parallel>, #tpu.dimension_semantics<arbitrary>], iteration_bounds = array<i64: 1, 3>, scalar_prefetch = 0 : i64, scratch_operands = 3 : i64, tpu.core_type = #tpu.core_type<tc>, window_params = [{transform_indices = @transform_0, window_bounds = array<i64: 8, 8, 128>}, {transform_indices = @transform_1, window_bounds = array<i64: 8, 8, 128>}, {transform_indices = @transform_2, window_bounds = array<i64: 8, 8, 128>}, {pipeline_mode = #tpu.pipeline_mode<synchronous>, transform_indices = @transform_3, window_bounds = array<i64: 128, 128>}, {pipeline_mode = #tpu.pipeline_mode<synchronous>, transform_indices = @transform_4, window_bounds = array<i64: 1, 128>}, {transform_indices = @transform_5, window_bounds = array<i64: 8, 128>}]} {
    %c0_i32 = arith.constant 0 : i32
    %0 = arith.cmpi eq, %arg1, %c0_i32 : i32
    %1 = arith.extui %0 : i1 to i32
    %c0_i32_0 = arith.constant 0 : i32
    %2 = arith.cmpi ne, %1, %c0_i32_0 : i32
    scf.if %2 {
      %cst_29 = arith.constant 0xFF800000 : f32
      %31 = vector.broadcast %cst_29 : f32 to vector<8x128xf32>
      %c0_30 = arith.constant 0 : index
      %c0_31 = arith.constant 0 : index
      %32 = vector.load %arg8[%c0_30, %c0_31] : memref<8x128xf32, #tpu.memory_space<vmem>>, vector<8x128xf32>
      tpu.vector_store %arg8[%c0_30, %c0_31], %31 {strides = array<i32>} : memref<8x128xf32, #tpu.memory_space<vmem>>, vector<8x128xf32>,
      %c0_32 = arith.constant 0 : index
      %c0_33 = arith.constant 0 : index
      %33 = vector.load %arg9[%c0_32, %c0_33] : memref<8x128xf32, #tpu.memory_space<vmem>>, vector<8x128xf32>
      tpu.vector_store %arg9[%c0_32, %c0_33], %31 {strides = array<i32>} : memref<8x128xf32, #tpu.memory_space<vmem>>, vector<8x128xf32>,
      %c0_34 = arith.constant 0 : index
      %c0_35 = arith.constant 0 : index
      %34 = vector.load %arg10[%c0_34, %c0_35] : memref<8x128xf32, #tpu.memory_space<vmem>>, vector<8x128xf32>
      tpu.vector_store %arg10[%c0_34, %c0_35], %31 {strides = array<i32>} : memref<8x128xf32, #tpu.memory_space<vmem>>, vector<8x128xf32>,
    } else {
    }
    %c0 = arith.constant 0 : index
    %c0_1 = arith.constant 0 : index
    %3 = vector.load %arg5[%c0, %c0_1] : memref<128x128xbf16, #tpu.memory_space<vmem>>, vector<128x128xbf16>
    %c0_2 = arith.constant 0 : index
    %c0_3 = arith.constant 0 : index
    %c0_4 = arith.constant 0 : index
    %4 = vector.load %arg2[%c0_2, %c0_3, %c0_4] : memref<8x8x128xbf16, #tpu.memory_space<vmem>>, vector<8x8x128xbf16>
    %5 = vector.shape_cast %4 : vector<8x8x128xbf16> to vector<64x128xbf16>
    %cst = arith.constant dense<0.000000e+00> : vector<64x128xf32>
    %6 = tpu.matmul %5, %3, %cst {dimension_numbers = #tpu.dot_dimension_numbers<[1], [0], [0], [1], [0, 0, 1, 1], [], []>} : vector<64x128xbf16>, vector<128x128xbf16>, vector<64x128xf32> -> vector<64x128xf32>
    %7 = vector.shape_cast %6 : vector<64x128xf32> to vector<8x8x128xf32>
    %c0_5 = arith.constant 0 : index
    %c0_6 = arith.constant 0 : index
    %8 = vector.load %arg8[%c0_5, %c0_6] : memref<8x128xf32, #tpu.memory_space<vmem>>, vector<8x128xf32>
    %cst_7 = arith.constant dense<0xFF800000> : vector<8x128xf32>
    %9 = vector.multi_reduction <maximumf>, %7, %cst_7 [1] : vector<8x8x128xf32> to vector<8x128xf32>
    %10 = arith.maximumf %8, %9 : vector<8x128xf32>
    %c0_8 = arith.constant 0 : index
    %c0_9 = arith.constant 0 : index
    %11 = vector.load %arg8[%c0_8, %c0_9] : memref<8x128xf32, #tpu.memory_space<vmem>>, vector<8x128xf32>
    tpu.vector_store %arg8[%c0_8, %c0_9], %10 {strides = array<i32>} : memref<8x128xf32, #tpu.memory_space<vmem>>, vector<8x128xf32>,
    %c0_10 = arith.constant 0 : index
    %c0_11 = arith.constant 0 : index
    %c0_12 = arith.constant 0 : index
    %12 = vector.load %arg3[%c0_10, %c0_11, %c0_12] : memref<8x8x128xbf16, #tpu.memory_space<vmem>>, vector<8x8x128xbf16>
    %13 = vector.shape_cast %12 : vector<8x8x128xbf16> to vector<64x128xbf16>
    %cst_13 = arith.constant dense<0.000000e+00> : vector<64x128xf32>
    %14 = tpu.matmul %13, %3, %cst_13 {dimension_numbers = #tpu.dot_dimension_numbers<[1], [0], [0], [1], [0, 0, 1, 1], [], []>} : vector<64x128xbf16>, vector<128x128xbf16>, vector<64x128xf32> -> vector<64x128xf32>
    %15 = vector.shape_cast %14 : vector<64x128xf32> to vector<8x8x128xf32>
    %c0_14 = arith.constant 0 : index
    %c0_15 = arith.constant 0 : index
    %16 = vector.load %arg9[%c0_14, %c0_15] : memref<8x128xf32, #tpu.memory_space<vmem>>, vector<8x128xf32>
    %cst_16 = arith.constant dense<0xFF800000> : vector<8x128xf32>
    %17 = vector.multi_reduction <maximumf>, %15, %cst_16 [1] : vector<8x8x128xf32> to vector<8x128xf32>
    %18 = arith.maximumf %16, %17 : vector<8x128xf32>
    %c0_17 = arith.constant 0 : index
    %c0_18 = arith.constant 0 : index
    %19 = vector.load %arg9[%c0_17, %c0_18] : memref<8x128xf32, #tpu.memory_space<vmem>>, vector<8x128xf32>
    tpu.vector_store %arg9[%c0_17, %c0_18], %18 {strides = array<i32>} : memref<8x128xf32, #tpu.memory_space<vmem>>, vector<8x128xf32>,
    %c0_19 = arith.constant 0 : index
    %c0_20 = arith.constant 0 : index
    %c0_21 = arith.constant 0 : index
    %20 = vector.load %arg4[%c0_19, %c0_20, %c0_21] : memref<8x8x128xbf16, #tpu.memory_space<vmem>>, vector<8x8x128xbf16>
    %21 = vector.shape_cast %20 : vector<8x8x128xbf16> to vector<64x128xbf16>
    %cst_22 = arith.constant dense<0.000000e+00> : vector<64x128xf32>
    %22 = tpu.matmul %21, %3, %cst_22 {dimension_numbers = #tpu.dot_dimension_numbers<[1], [0], [0], [1], [0, 0, 1, 1], [], []>} : vector<64x128xbf16>, vector<128x128xbf16>, vector<64x128xf32> -> vector<64x128xf32>
    %23 = vector.shape_cast %22 : vector<64x128xf32> to vector<8x8x128xf32>
    %c0_23 = arith.constant 0 : index
    %c0_24 = arith.constant 0 : index
    %24 = vector.load %arg10[%c0_23, %c0_24] : memref<8x128xf32, #tpu.memory_space<vmem>>, vector<8x128xf32>
    %cst_25 = arith.constant dense<0xFF800000> : vector<8x128xf32>
    %25 = vector.multi_reduction <maximumf>, %23, %cst_25 [1] : vector<8x8x128xf32> to vector<8x128xf32>
    %26 = arith.maximumf %24, %25 : vector<8x128xf32>
    %c0_26 = arith.constant 0 : index
    %c0_27 = arith.constant 0 : index
    %27 = vector.load %arg10[%c0_26, %c0_27] : memref<8x128xf32, #tpu.memory_space<vmem>>, vector<8x128xf32>
    tpu.vector_store %arg10[%c0_26, %c0_27], %26 {strides = array<i32>} : memref<8x128xf32, #tpu.memory_space<vmem>>, vector<8x128xf32>,
    %c2_i32 = arith.constant 2 : i32
    %28 = arith.cmpi eq, %arg1, %c2_i32 : i32
    %29 = arith.extui %28 : i1 to i32
    %c0_i32_28 = arith.constant 0 : i32
    %30 = arith.cmpi ne, %29, %c0_i32_28 : i32
    scf.if %30 {
      %c0_29 = arith.constant 0 : index
      %c0_30 = arith.constant 0 : index
      %31 = vector.load %arg6[%c0_29, %c0_30] : memref<1x128xf32, #tpu.memory_space<vmem>>, vector<1x128xf32>
      %c0_31 = arith.constant 0 : index
      %c0_32 = arith.constant 0 : index
      %32 = vector.load %arg8[%c0_31, %c0_32] : memref<8x128xf32, #tpu.memory_space<vmem>>, vector<8x128xf32>
      %33 = vector.broadcast %31 : vector<1x128xf32> to vector<8x128xf32>
      %34 = arith.addf %32, %33 : vector<8x128xf32>
      %c0_33 = arith.constant 0 : index
      %c0_34 = arith.constant 0 : index
      %35 = vector.load %arg9[%c0_33, %c0_34] : memref<8x128xf32, #tpu.memory_space<vmem>>, vector<8x128xf32>
      %36 = vector.broadcast %31 : vector<1x128xf32> to vector<8x128xf32>
      %37 = arith.addf %35, %36 : vector<8x128xf32>
      %c0_35 = arith.constant 0 : index
      %c0_36 = arith.constant 0 : index
      %38 = vector.load %arg10[%c0_35, %c0_36] : memref<8x128xf32, #tpu.memory_space<vmem>>, vector<8x128xf32>
      %39 = vector.broadcast %31 : vector<1x128xf32> to vector<8x128xf32>
      %40 = arith.addf %38, %39 : vector<8x128xf32>
      %41 = arith.mulf %34, %34 : vector<8x128xf32>
      %cst_37 = arith.constant dense<0.000000e+00> : vector<8xf32>
      %42 = vector.multi_reduction <add>, %41, %cst_37 [1] : vector<8x128xf32> to vector<8xf32>
      %43 = vector.shape_cast %42 : vector<8xf32> to vector<8x1xf32>
      %cst_38 = arith.constant 1.000000e-24 : f32
      %44 = vector.broadcast %cst_38 : f32 to vector<8x1xf32>
      %45 = arith.maximumf %43, %44 : vector<8x1xf32>
      %46 = math.rsqrt %45 : vector<8x1xf32>
      %47 = vector.broadcast %46 : vector<8x1xf32> to vector<8x128xf32>
      %48 = arith.mulf %34, %47 : vector<8x128xf32>
      %49 = arith.mulf %37, %37 : vector<8x128xf32>
      %cst_39 = arith.constant dense<0.000000e+00> : vector<8xf32>
      %50 = vector.multi_reduction <add>, %49, %cst_39 [1] : vector<8x128xf32> to vector<8xf32>
      %51 = vector.shape_cast %50 : vector<8xf32> to vector<8x1xf32>
      %cst_40 = arith.constant 1.000000e-24 : f32
      %52 = vector.broadcast %cst_40 : f32 to vector<8x1xf32>
      %53 = arith.maximumf %51, %52 : vector<8x1xf32>
      %54 = math.rsqrt %53 : vector<8x1xf32>
      %55 = vector.broadcast %54 : vector<8x1xf32> to vector<8x128xf32>
      %56 = arith.mulf %37, %55 : vector<8x128xf32>
      %57 = arith.mulf %40, %40 : vector<8x128xf32>
      %cst_41 = arith.constant dense<0.000000e+00> : vector<8xf32>
      %58 = vector.multi_reduction <add>, %57, %cst_41 [1] : vector<8x128xf32> to vector<8xf32>
      %59 = vector.shape_cast %58 : vector<8xf32> to vector<8x1xf32>
      %cst_42 = arith.constant 1.000000e-24 : f32
      %60 = vector.broadcast %cst_42 : f32 to vector<8x1xf32>
      %61 = arith.maximumf %59, %60 : vector<8x1xf32>
      %62 = math.rsqrt %61 : vector<8x1xf32>
      %63 = vector.broadcast %62 : vector<8x1xf32> to vector<8x128xf32>
      %64 = arith.mulf %40, %63 : vector<8x128xf32>
      %65 = arith.mulf %48, %56 : vector<8x128xf32>
      %cst_43 = arith.constant dense<0.000000e+00> : vector<8xf32>
      %66 = vector.multi_reduction <add>, %65, %cst_43 [1] : vector<8x128xf32> to vector<8xf32>
      %67 = vector.shape_cast %66 : vector<8xf32> to vector<8x1xf32>
      %cst_44 = arith.constant 1.000000e+00 : f32
      %68 = vector.broadcast %cst_44 : f32 to vector<8x1xf32>
      %69 = arith.subf %68, %67 : vector<8x1xf32>
      %70 = arith.mulf %48, %64 : vector<8x128xf32>
      %cst_45 = arith.constant dense<0.000000e+00> : vector<8xf32>
      %71 = vector.multi_reduction <add>, %70, %cst_45 [1] : vector<8x128xf32> to vector<8xf32>
      %72 = vector.shape_cast %71 : vector<8xf32> to vector<8x1xf32>
      %cst_46 = arith.constant 1.000000e+00 : f32
      %73 = vector.broadcast %cst_46 : f32 to vector<8x1xf32>
      %74 = arith.subf %73, %72 : vector<8x1xf32>
      %75 = arith.cmpf ogt, %74, %69 : vector<8x1xf32>
      %76 = arith.extui %75 : vector<8x1xi1> to vector<8x1xi32>
      %77 = arith.sitofp %76 : vector<8x1xi32> to vector<8x1xf32>
      %78 = arith.subf %69, %74 : vector<8x1xf32>
      %cst_47 = arith.constant 1.000000e-01 : f32
      %79 = vector.broadcast %cst_47 : f32 to vector<8x1xf32>
      %80 = arith.addf %78, %79 : vector<8x1xf32>
      %cst_48 = arith.constant 0.000000e+00 : f32
      %81 = vector.broadcast %cst_48 : f32 to vector<8x1xf32>
      %82 = arith.maximumf %80, %81 : vector<8x1xf32>
      %83 = tpu.iota {dimensions = array<i32: 1>} : vector<8x128xi32>
      %c0_i32_49 = arith.constant 0 : i32
      %84 = vector.broadcast %c0_i32_49 : i32 to vector<8x128xi32>
      %85 = arith.cmpi eq, %83, %84 : vector<8x128xi32>
      %cst_50 = arith.constant 0.000000e+00 : f32
      %86 = vector.shape_cast %69 : vector<8x1xf32> to vector<8x1xf32>
      %87 = vector.broadcast %86 : vector<8x1xf32> to vector<8x128xf32>
      %88 = vector.broadcast %cst_50 : f32 to vector<8x128xf32>
      %89 = arith.select %85, %87, %88 : vector<8x128xi1>, vector<8x128xf32>
      %c1_i32 = arith.constant 1 : i32
      %90 = vector.broadcast %c1_i32 : i32 to vector<8x128xi32>
      %91 = arith.cmpi eq, %83, %90 : vector<8x128xi32>
      %92 = vector.shape_cast %74 : vector<8x1xf32> to vector<8x1xf32>
      %93 = vector.broadcast %92 : vector<8x1xf32> to vector<8x128xf32>
      %94 = arith.select %91, %93, %89 : vector<8x128xi1>, vector<8x128xf32>
      %c2_i32_51 = arith.constant 2 : i32
      %95 = vector.broadcast %c2_i32_51 : i32 to vector<8x128xi32>
      %96 = arith.cmpi eq, %83, %95 : vector<8x128xi32>
      %97 = vector.shape_cast %77 : vector<8x1xf32> to vector<8x1xf32>
      %98 = vector.broadcast %97 : vector<8x1xf32> to vector<8x128xf32>
      %99 = arith.select %96, %98, %94 : vector<8x128xi1>, vector<8x128xf32>
      %c3_i32 = arith.constant 3 : i32
      %100 = vector.broadcast %c3_i32 : i32 to vector<8x128xi32>
      %101 = arith.cmpi eq, %83, %100 : vector<8x128xi32>
      %102 = vector.shape_cast %82 : vector<8x1xf32> to vector<8x1xf32>
      %103 = vector.broadcast %102 : vector<8x1xf32> to vector<8x128xf32>
      %104 = arith.select %101, %103, %99 : vector<8x128xi1>, vector<8x128xf32>
      %c0_52 = arith.constant 0 : index
      %c0_53 = arith.constant 0 : index
      %105 = vector.load %arg7[%c0_52, %c0_53] : memref<8x128xf32, #tpu.memory_space<vmem>>, vector<8x128xf32>
      tpu.vector_store %arg7[%c0_52, %c0_53], %104 {strides = array<i32>} : memref<8x128xf32, #tpu.memory_space<vmem>>, vector<8x128xf32>,
    } else {
    }
    return
  }
  func.func @transform_0(%arg0: i32, %arg1: i32) -> (i32, i32, i32) {
    %c0_i32 = arith.constant 0 : i32
    %c0_i32_0 = arith.constant 0 : i32
    return %arg0, %arg1, %c0_i32 : i32, i32, i32
  }
  func.func @transform_1(%arg0: i32, %arg1: i32) -> (i32, i32, i32) {
    %c0_i32 = arith.constant 0 : i32
    %c0_i32_0 = arith.constant 0 : i32
    return %arg0, %arg1, %c0_i32 : i32, i32, i32
  }
  func.func @transform_2(%arg0: i32, %arg1: i32) -> (i32, i32, i32) {
    %c0_i32 = arith.constant 0 : i32
    %c0_i32_0 = arith.constant 0 : i32
    return %arg0, %arg1, %c0_i32 : i32, i32, i32
  }
  func.func @transform_3(%arg0: i32, %arg1: i32) -> (i32, i32) {
    %c0_i32 = arith.constant 0 : i32
    %c0_i32_0 = arith.constant 0 : i32
    %c0_i32_1 = arith.constant 0 : i32
    return %c0_i32, %c0_i32_0 : i32, i32
  }
  func.func @transform_4(%arg0: i32, %arg1: i32) -> (i32, i32) {
    %c0_i32 = arith.constant 0 : i32
    %c0_i32_0 = arith.constant 0 : i32
    %c0_i32_1 = arith.constant 0 : i32
    return %c0_i32, %c0_i32_0 : i32, i32
  }
  func.func @transform_5(%arg0: i32, %arg1: i32) -> (i32, i32) {
    %c0_i32 = arith.constant 0 : i32
    %c0_i32_0 = arith.constant 0 : i32
    return %arg0, %c0_i32 : i32, i32
  }
}

</mosaic_0001>

<bundles_post_ra>
// kernel: tpu_custom_call.1
= control target key start
LH: loop header
LB: loop body
LE: loop exit
PB: predicated region body
PF: predicated region fallthrough
CT: control target
= control target key end

     0   :  { %s1738_s0 = inlined_call_operand.hbm [shape: bf16[8,24,128], index: 0, kind: input, shape index: {}]   ;;  %s1739_s1 = inlined_call_operand.hbm [shape: bf16[8,24,128], index: 1, kind: input, shape index: {}]   ;;  %s1740_s2 = inlined_call_operand.hbm [shape: bf16[8,24,128], index: 2, kind: input, shape index: {}]   ;;  %s1741_s3 = inlined_call_operand.hbm [shape: bf16[128,128], index: 3, kind: input, shape index: {}]   ;;  %s1742_s4 = inlined_call_operand.vmem [shape: f32[1,128], index: 4, kind: input, shape index: {}]   ;;  %s1743_s5 = inlined_call_operand.hbm [shape: f32[8,128], index: 5, kind: output, shape index: {}]  }
   0x1   :  { %1748 = sst [smem:[#allocation19_spill]] %s1738_s0 }
   0x2   :  { %1749 = sst [smem:[#allocation20_spill]] %s1739_s1 }
   0x3   :  { %1750 = sst [smem:[#allocation21_spill]] %s1741_s3 }
   0x4   :  { %10 = vsyncpa [#allocation6], 0 }
   0x5   :  { %12 = vsyncpa [#allocation6 + $0x1], 0 }
   0x6   :  { %13 = vsyncpa [#allocation9], 0 }
   0x7   :  { %15 = vsyncpa [#allocation9 + $0x1], 0 }
   0x8   :  { %16 = vsyncpa [#allocation12], 0 }
   0x9   :  { %17 = vsyncpa [#allocation7], 0  ;;  %s1514_s18 = smov 0   ;;  %s1516_s19 = smov 0  }
   0xa   :  { %s1518_s20 = smov 0   ;;  %s1520_s21 = smov 0  }
   0xb   :  { %s1522_s22 = smov 0   ;;  %s1524_s23 = smov 0  }
   0xc LB: > { %s32_s24 = sadd.s32 1, %s1471_s22  ;;  %s44_s25 = sadd.s32 1, %s1463_s20  ;;  %s1475_s23 = sphi %s1524_s23, %s23_s23   ;;  %s1471_s22 = sphi %s1522_s22, %s1765_s22   ;;  %s1467_s21 = sphi %s1520_s21, %s1764_s21   ;;  %s1463_s20 = sphi %s1518_s20, %s1763_s20   ;;  %s1459_s19 = sphi %s1516_s19, %s1762_s19   ;;  %s1455_s18 = sphi %s1514_s18, %s1761_s18  }
   0xd   : > { %p33_p0 = scmp.ge.s32.totalorder %s32_s24, 3  ;;  %p51_p1 = scmp.ne.s32.totalorder %s1463_s20, %s1459_s19 }
   0xe   : > { %p52_p2 = scmp.eq.s32.totalorder %s1475_s23, 0  ;;  %p1199_p5 = scmp.lt.s32.totalorder %s1475_s23, 3 }
   0xf   : > { %s1767_s24 = smov (%p33_p0, %s32_s24), 0  ;;  %s1746_s27 = sand.u32 1, %s1463_s20  }
  0x10   : > { %1751 = sst [smem:[#allocation18_spill]] %s1767_s24  ;;  %p53_p3 = por %p52_p2, %p51_p1 }
  0x11   : > { %s40_s26 = ssub.s32 %s1471_s22, %s1767_s24  ;;  %s1556_s28 = sshll.u32 %s1471_s22, 2 }
  0x12   : > { %p42_p4 = scmp.eq.s32.totalorder %s40_s26, 0  ;;  %s1563_s30 = sshll.u32 %s1746_s27, 5 }
  0x13   : > { %p1565_p6 = pnand %p1199_p5, %p53_p3  ;;  %s246_s7 = sand.u32 1, %s1475_s23  }
  0x14   : > { %s1559_s29 = scalar_select %p42_p4, %s1463_s20, %s44_s25  }
  0x15   : > { %s1753_s1 = sld [smem:[#allocation20_spill]]  ;;  %s250_s12 = scalar_lea.vmem [#allocation8], %s1563_s30 }
  0x16   : > { %s260_s13 = sshll.u32 %s250_s12, 4  ;;  %s1575_s14 = scalar_lea.sflag [#allocation9], %s246_s7  ;;  %s261_s13 = int_to_ptr.vmem [resolvable:$true] %s260_s13 }
  0x17   : > { %s1744_s15 = smov 192   ;;  %s1478_s16 = smov 64  }
  0x18   : > { %s1479_s17 = smov 4   ;;  %s1584_s25 = sadd.s32 4294967295, %s1475_s23  }
  0x19   : > { %p57_p7 = scmp.ne.s32.totalorder %s1459_s19, %s1455_s18  ;;  %p58_p8 = scmp.eq.s32.totalorder %s1584_s25, 0 }
  0x1a   : > { %p1041_p9 = scmp.ge.s32.totalorder %s1475_s23, 1  ;;  %p192_p10 = scmp.lt.s32.totalorder %s1475_s23, 4 }
  0x1b   : > { %s257_s10 = scalar_lea.hbm %s1753_s1, %s1556_s28  ;;  %p1593_p11 = por %p58_p8, %p57_p7 }
  0x1c   : > { %s258_s11 = sshll.u32 %s257_s10, 4  ;;  %s1755_s3 = sld [smem:[#allocation21_spill]]  ;;  %s259_s11 = int_to_ptr.hbm [resolvable:$true] %s258_s11 }
  0x1d   : > { %1194 = dma.hbm_to_vmem [thread:$0]  (!%p1565_p6), %s259_s11, 512, %s261_s13, %s1575_s14, %s1744_s15, %s1478_s16, %s1479_s17  }
  0x1e   : > { %p1600_p12 = pnand %p1041_p9, %p192_p10  ;;  %s1480_s18 = smov [#allocation11]  }
  0x1f   : > { %s205_s11 = sshll.u32 %s1480_s18, 4  ;;  %s1757_s0 = sld [smem:[#allocation19_spill]]  ;;  %s206_s11 = int_to_ptr.vmem [resolvable:$true] %s205_s11 }
  0x20   : > { %p1184_p13 = pneg %p1600_p12  ;;  %s226_s15 = scalar_lea.vmem [#allocation5], %s1563_s30 }
  0x21   : > { %s236_s27 = sshll.u32 %s226_s15, 4  ;;  %s1758_s1 = sand.u32 1, %s1463_s20   ;;  %s237_s27 = int_to_ptr.vmem [resolvable:$true] %s236_s27 }
  0x22   : > { %s203_s9 = sshll.u32 %s1755_s3, 4  ;;  %p1185_p0 = pnand %p1184_p13, %p58_p8  ;;  %s204_s9 = int_to_ptr.hbm [resolvable:$true] %s203_s9 }
  0x23   : > { %s223_s18 = scalar_lea.sflag [#allocation6], %s1758_s1  ;;  %s1759_s3 = smov 192  }
  0x24   : > { %1187 = dma.hbm_to_vmem [thread:$0]  (!%p1185_p0), %s204_s9, 1024, %s206_s11, [#allocation12], %s1478_s16, %s1478_s16, %s1479_s17  }
  0x25   : > { %s233_s7 = scalar_lea.hbm %s1757_s0, %s1556_s28  ;;  %s281_s0 = scalar_lea.hbm %s1740_s2, %s1556_s28 }
  0x26   : > { %s234_s8 = sshll.u32 %s233_s7, 4  ;;  %s274_s7 = scalar_lea.vmem [#allocation10], %s1563_s30  ;;  %s235_s8 = int_to_ptr.hbm [resolvable:$true] %s234_s8 }
  0x27   : > { %1191 = dma.hbm_to_vmem [thread:$0]  (!%p1565_p6), %s235_s8, 512, %s237_s27, %s223_s18, %s1759_s3, %s1478_s16, %s1479_s17  }
  0x28   : > { %s284_s24 = sshll.u32 %s274_s7, 4  ;;  %s282_s15 = sshll.u32 %s281_s0, 4  ;;  %s285_s24 = int_to_ptr.vmem [resolvable:$true] %s284_s24  ;;  %s283_s15 = int_to_ptr.hbm [resolvable:$true] %s282_s15 }
  0x29   : > { %1197 = dma.hbm_to_vmem [thread:$0]  (!%p1565_p6), %s283_s15, 512, %s285_s24, %s1575_s14, %s1759_s3, %s1478_s16, %s1479_s17  }
  0x2a   : > { %296 = sbr.rel (%p1600_p12) target bundleno = 587 (0x24b), region = 40  ;;  %s298_s1 = sand.u32 (!%p1600_p12), 1, %s1459_s19  }
  0x2b   : > { %s1051_s27 = sshll.u32 (!%p1600_p12), %s298_s1, 5  ;;  %s299_s9 = scalar_lea.sflag (!%p1600_p12), [#allocation6], %s298_s1 }
  0x2c   : > { %s1637_s11 = scalar_lea.vmem (!%p1600_p12), [#allocation5], %s1051_s27 }
  0x2f   : > { %1438 = dma.done.wait (%p1593_p11), %s299_s9, 512  }
  0x30   : > { %1440 = vsyncadd (%p1593_p11), %s299_s9, 4294966784  ;;  %s308_s0 = sand.u32 1, %s1584_s25   ;;  %s1644_s3 = scalar_lea.vmem [#allocation8], %s1051_s27 }
  0x31   : > { %s309_s28 = scalar_lea.sflag [#allocation9], %s308_s0 }
  0x32   : > { %1442 = dma.done.wait (%p1593_p11), %s309_s28, 1024  }
  0x33   : > { %1444 = vsyncadd (%p1593_p11), %s309_s28, 4294966272  ;;  %s1650_s24 = scalar_lea.vmem [#allocation10], %s1051_s27 }
  0x34   : > { %1446 = dma.done.wait (%p58_p8), [#allocation12], 1024  }
  0x35   : > { %1448 = vsyncadd (%p58_p8), [#allocation12], 4294966272  ;;  %p1055_p1 = scmp.ne.s32.totalorder %s1467_s21, 0 }
  0x37   : > { %366 = sbr.rel (%p1055_p1) target bundleno = 64 (0x40), region = 60 }
  0x3c   : > { %v1481_v0 = vmov -inf  }
  0x3d   : > { %367 = vst [vmem:[#allocation2] sm:$0xff] %v1481_v0 }
  0x3e   : > { %368 = vst [vmem:[#allocation3] sm:$0xff] %v1481_v0 }
  0x3f   : > { %369 = vst [vmem:[#allocation4] sm:$0xff] %v1481_v0 }
  0x40 PF: > { %v1149_v1 = vld [vmem:[#allocation11 + $0x38] sm:$0xff]  ;;  %v1148_v2 = vld [vmem:[#allocation11 + $0x30] sm:$0xff]  ;;  %v1147_v3 = vld [vmem:[#allocation11 + $0x28] sm:$0xff]  ;;  %vm552_vm0 = vcmask 1041409   ;;  %vm554_vm1 = vcmask 1042434   ;;  %vm556_vm2 = vcmask 1043459  }
  0x41   : > { %1162 = vmatpush.bf16.msra.mxu3 %v1149_v1  ;;  %601 = vmatpush.bf16.msra.mxu1 %v1149_v1  ;;  %v1146_v4 = vld [vmem:[#allocation11 + $0x20] sm:$0xff]  ;;  %v1145_v5 = vld [vmem:[#allocation11 + $0x18] sm:$0xff]  ;;  %v1144_v6 = vld [vmem:[#allocation11 + $0x10] sm:$0xff]  ;;  %vm558_vm3 = vcmask 1044484   ;;  %vm560_vm4 = vcmask 1045509   ;;  %vm562_vm5 = vcmask 1046534  }
  0x42   : > { %729 = vmatpush.bf16.msra.mxu2 %v1149_v1  ;;  %466 = vmatpush.bf16.msra.mxu0 %v1149_v1  ;;  %v1143_v7 = vld [vmem:[#allocation11 + $0x8] sm:$0xff]  ;;  %v1142_v8 = vld [vmem:[#allocation11] sm:$0xff]  ;;  %v1152_v13 = vld [vmem:[%s1637_s11 + $0x10] sm:$0xff]  ;;  %vm564_vm6 = vcmask 1047559   ;;  %p1136_p2 = scmp.ne.s32.totalorder %s1467_s21, 2 }
  0x43   : > { %v1151_v9 = vld [vmem:[%s1637_s11 + $0x8] sm:$0xff]  ;;  %v1154_v10 = vld [vmem:[%s1644_s3] sm:$0xff]  ;;  %v1153_v16 = vld [vmem:[%s1637_s11 + $0x18] sm:$0xff] }
  0x44   : > { %v1158_v11 = vld [vmem:[%s1650_s24] sm:$0xff]  ;;  %v1155_v14 = vld [vmem:[%s1644_s3 + $0x8] sm:$0xff]  ;;  %v1156_v17 = vld [vmem:[%s1644_s3 + $0x10] sm:$0xff] }
  0x45   : > { %1163 = vmatpush.bf16.msra.mxu3 %v1148_v2  ;;  %602 = vmatpush.bf16.msra.mxu1 %v1148_v2  ;;  %v1150_v12 = vld [vmem:[%s1637_s11] sm:$0xff]  ;;  %v1159_v15 = vld [vmem:[%s1650_s24 + $0x8] sm:$0xff]  ;;  %v1160_v18 = vld [vmem:[%s1650_s24 + $0x10] sm:$0xff] }
  0x46   : > { %730 = vmatpush.bf16.msra.mxu2 %v1148_v2  ;;  %467 = vmatpush.bf16.msra.mxu0 %v1148_v2  ;;  %v1157_v19 = vld [vmem:[%s1644_s3 + $0x18] sm:$0xff] }
  0x47   : > { %v1161_v20 = vld [vmem:[%s1650_s24 + $0x18] sm:$0xff] }
  0x49   : > { %1164 = vmatpush.bf16.msra.mxu3 %v1147_v3  ;;  %603 = vmatpush.bf16.msra.mxu1 %v1147_v3 }
  0x4a   : > { %731 = vmatpush.bf16.msra.mxu2 %v1147_v3  ;;  %468 = vmatpush.bf16.msra.mxu0 %v1147_v3 }
  0x4d   : > { %1165 = vmatpush.bf16.msra.mxu3 %v1146_v4  ;;  %604 = vmatpush.bf16.msra.mxu1 %v1146_v4 }
  0x4e   : > { %732 = vmatpush.bf16.msra.mxu2 %v1146_v4  ;;  %469 = vmatpush.bf16.msra.mxu0 %v1146_v4 }
  0x51   : > { %1166 = vmatpush.bf16.msra.mxu3 %v1145_v5  ;;  %605 = vmatpush.bf16.msra.mxu1 %v1145_v5 }
  0x52   : > { %733 = vmatpush.bf16.msra.mxu2 %v1145_v5  ;;  %470 = vmatpush.bf16.msra.mxu0 %v1145_v5 }
  0x55   : > { %1167 = vmatpush.bf16.msra.mxu3 %v1144_v6  ;;  %606 = vmatpush.bf16.msra.mxu1 %v1144_v6 }
  0x56   : > { %734 = vmatpush.bf16.msra.mxu2 %v1144_v6  ;;  %471 = vmatpush.bf16.msra.mxu0 %v1144_v6 }
  0x59   : > { %1168 = vmatpush.bf16.msra.mxu3 %v1143_v7  ;;  %607 = vmatpush.bf16.msra.mxu1 %v1143_v7 }
  0x5a   : > { %735 = vmatpush.bf16.msra.mxu2 %v1143_v7  ;;  %472 = vmatpush.bf16.msra.mxu0 %v1143_v7 }
  0x5d   : > { %1169 = vmatpush.bf16.msra.mxu3 %v1142_v8  ;;  %608 = vmatpush.bf16.msra.mxu1 %v1142_v8 }
  0x5e   : > { %736 = vmatpush.bf16.msra.mxu2 %v1142_v8  ;;  %473 = vmatpush.bf16.msra.mxu0 %v1142_v8 }
  0x60   : > { %479 = vmatmul.bf16.vlgmr.msra.gmra.mxu3 %v1151_v9  ;;  %609 = vmatmul.bf16.vlgmr.msra.gmra.mxu1 %v1154_v10 }
  0x61   : > { %737 = vmatmul.bf16.vlgmr.msra.gmra.mxu2 %v1158_v11  ;;  %474 = vmatmul.bf16.vlgmr.msra.gmra.mxu0 %v1150_v12 }
  0x70   : > { %484 = vmatmul.bf16.gmra.mxu3 %v1152_v13  ;;  %614 = vmatmul.bf16.gmra.mxu1 %v1155_v14 }
  0x71   : > { %742 = vmatmul.bf16.gmra.mxu2 %v1159_v15 }
  0x80   : > { %489 = vmatmul.bf16.gmra.mxu3 %v1153_v16  ;;  %619 = vmatmul.bf16.gmra.mxu1 %v1156_v17 }
  0x81   : > { %747 = vmatmul.bf16.gmra.mxu2 %v1160_v18 }
  0x90   : > { %624 = vmatmul.bf16.gmra.mxu1 %v1157_v19 }
  0x91   : > { %752 = vmatmul.bf16.gmra.mxu2 %v1161_v20 }
  0xdd   : > { %v610_v21 = vpop.f32.mrf.mxu1 }
  0xde   : > { %v475_v23 = vpop.f32.mrf.mxu0  ;;  %v631_v32 = vrot.slane %v610_v21, 4 }
  0xdf   : > { %v496_v30 = vrot.slane %v475_v23, 4 }
  0xe0   : > { %v632_v40 = vmax.f32 %v610_v21, %v631_v32 }
  0xe1   : > { %v497_v34 = vmax.f32 %v475_v23, %v496_v30 }
  0xe2   : > { %v633_v46 = vrot.slane %v632_v40, 2 }
  0xe3   : > { %v480_v22 = vpop.f32.mrf.mxu3  ;;  %v498_v41 = vrot.slane %v497_v34, 2 }
  0xe4   : > { %v738_v24 = vpop.f32.mrf.mxu2  ;;  %v508_v35 = vrot.slane %v480_v22, 4  ;;  %v634_v59 = vmax.f32 %v632_v40, %v633_v46 }
  0xe5   : > { %v612_v25 = vpop.f32.mrf.mxu1  ;;  %v499_v48 = vmax.f32 %v497_v34, %v498_v41  ;;  %v759_v56 = vrot.slane %v738_v24, 4 }
  0xe6   : > { %v477_v29 = vpop.f32.mrf.mxu0  ;;  %v637_v39 = vrot.slane %v612_v25, 4  ;;  %v509_v42 = vmax.f32 %v480_v22, %v508_v35  ;;  %v635_v6 = vrot.slane %v634_v59, 1 }
  0xe7   : > { %v502_v31 = vrot.slane %v477_v29, 4  ;;  %v500_v61 = vrot.slane %v499_v48, 1  ;;  %v760_v3 = vmax.f32 %v738_v24, %v759_v56 }
  0xe8   : > { %v638_v45 = vmax.f32 %v612_v25, %v637_v39  ;;  %v510_v49 = vrot.slane %v509_v42, 2 }
  0xe9   : > { %v503_v37 = vmax.f32 %v477_v29, %v502_v31  ;;  %v501_v9 = vmax.f32 %v499_v48, %v500_v61  ;;  %v761_v19 = vrot.slane %v760_v3, 2 }
  0xea   : > { %v639_v57 = vrot.slane %v638_v45, 2  ;;  %v511_v62 = vmax.f32 %v509_v42, %v510_v49 }
  0xeb   : > { %v482_v26 = vpop.f32.mrf.mxu3  ;;  %v504_v43 = vrot.slane %v503_v37, 2  ;;  %v1676_v34 = vmax.f32 %v760_v3, %v761_v19 }
  0xec   : > { %v740_v27 = vpop.f32.mrf.mxu2  ;;  %v514_v44 = vrot.slane %v482_v26, 4  ;;  %v640_v4 = vmax.f32 %v638_v45, %v639_v57  ;;  %v512_v10 = vrot.slane %v511_v62, 1 }
  0xed   : > { %v615_v28 = vpop.f32.mrf.mxu1  ;;  %v505_v51 = vmax.f32 %v503_v37, %v504_v43  ;;  %v765_v60 = vrot.slane %v740_v27, 4 }
  0xee   : > { %v515_v52 = vmax.f32 %v482_v26, %v514_v44  ;;  %v643_v53 = vrot.slane %v615_v28, 4  ;;  %v641_v20 = vrot.slane %v640_v4, 1  ;;  %v513_v25 = vmax.f32 %v511_v62, %v512_v10 }
  0xef   : > { %v506_v63 = vrot.slane %v505_v51, 1  ;;  %v766_v7 = vmax.f32 %v740_v27, %v765_v60 }
  0xf0   : > { %v516_v0 = vrot.slane %v515_v52, 2  ;;  %v644_v1 = vmax.f32 %v615_v28, %v643_v53  ;;  %v1678_v35 = vmax.f32 %v640_v4, %v641_v20 }
  0xf1   : > { %v507_v14 = vmax.f32 %v505_v51, %v506_v63  ;;  %v767_v23 = vrot.slane %v766_v7, 2 }
  0xf2   : > { %v517_v15 = vmax.f32 %v515_v52, %v516_v0  ;;  %v645_v16 = vrot.slane %v644_v1, 2 }
  0xf3   : > { %v485_v33 = vpop.f32.mrf.mxu3  ;;  %v553_v29 = vsel %vm552_vm0, %v507_v14, %v501_v9  ;;  %v1680_v39 = vmax.f32 %v766_v7, %v767_v23  ;;  %v495_v23 = vld [vmem:[#allocation2] sm:$0xff] }
  0xf4   : > { %v1669_v36 = vpop.f32.mrf.mxu2  ;;  %v520_v54 = vrot.slane %v485_v33, 4  ;;  %v518_v30 = vrot.slane %v517_v15, 1  ;;  %v646_v31 = vmax.f32 %v644_v1, %v645_v16  ;;  %v555_v43 = vsel %vm554_vm1, %v513_v25, %v553_v29 }
  0xf5   : > { %v617_v38 = vpop.f32.mrf.mxu1  ;;  %v771_v40 = vrot.slane %v1669_v36, 4 }
  0xf6   : > { %v521_v2 = vmax.f32 %v485_v33, %v520_v54  ;;  %v649_v11 = vrot.slane %v617_v38, 4  ;;  %v1674_v33 = vmax.f32 %v634_v59, %v635_v6  ;;  %v519_v48 = vmax.f32 %v517_v15, %v518_v30 }
  0xf7   : > { %v647_v49 = vrot.slane %v646_v31, 1 }
  0xf8   : > { %v522_v17 = vrot.slane %v521_v2, 2  ;;  %v650_v26 = vmax.f32 %v617_v38, %v649_v11 }
  0xf9   : > { %v648_v9 = vmax.f32 %v646_v31, %v647_v49 }
  0xfa   : > { %v523_v32 = vmax.f32 %v521_v2, %v522_v17  ;;  %v651_v44 = vrot.slane %v650_v26, 2  ;;  %v557_v2 = vsel %vm556_vm2, %v519_v48, %v555_v43  ;;  %v763_v43 = vrot.slane %v1676_v34, 1 }
  0xfb   : > { %v487_v47 = vpop.f32.mrf.mxu3  ;;  %v769_v48 = vrot.slane %v1680_v39, 1 }
  0xfc   : > { %v1671_v50 = vpop.f32.mrf.mxu2  ;;  %v526_v58 = vrot.slane %v487_v47, 4  ;;  %v524_v51 = vrot.slane %v523_v32, 1  ;;  %v652_v62 = vmax.f32 %v650_v26, %v651_v44 }
  0xfd   : > { %v620_v55 = vpop.f32.mrf.mxu1  ;;  %v777_v52 = vrot.slane %v1671_v50, 4 }
  0xfe   : > { %v527_v5 = vmax.f32 %v487_v47, %v526_v58  ;;  %v655_v24 = vrot.slane %v620_v55, 4  ;;  %v525_v3 = vmax.f32 %v523_v32, %v524_v51  ;;  %v653_v14 = vrot.slane %v652_v62, 1 }
  0xff   : > { %v778_v4 = vmax.f32 %v1671_v50, %v777_v52 }
 0x100   : > { %v528_v21 = vrot.slane %v527_v5, 2  ;;  %v656_v38 = vmax.f32 %v620_v55, %v655_v24  ;;  %v772_v55 = vmax.f32 %v1669_v36, %v771_v40  ;;  %v654_v44 = vmax.f32 %v652_v62, %v653_v14 }
 0x101   : > { %v779_v19 = vrot.slane %v778_v4, 2 }
 0x102   : > { %v529_v37 = vmax.f32 %v527_v5, %v528_v21  ;;  %v657_v59 = vrot.slane %v656_v38, 2 }
 0x103   : > { %v490_v8 = vpop.f32.mrf.mxu3  ;;  %v780_v40 = vmax.f32 %v778_v4, %v779_v19 }
 0x104   : > { %v532_v12 = vrot.slane %v490_v8, 4  ;;  %v748_v13 = vpop.f32.mrf.mxu2  ;;  %v530_v54 = vrot.slane %v529_v37, 1  ;;  %v658_v10 = vmax.f32 %v656_v38, %v657_v59 }
 0x105   : > { %v622_v18 = vpop.f32.mrf.mxu1  ;;  %v783_v56 = vrot.slane %v748_v13, 4 }
 0x106   : > { %v533_v22 = vmax.f32 %v490_v8, %v532_v12  ;;  %v661_v28 = vrot.slane %v622_v18, 4  ;;  %v531_v5 = vmax.f32 %v529_v37, %v530_v54  ;;  %v773_v12 = vrot.slane %v772_v55, 2 }
 0x107   : > { %v784_v6 = vmax.f32 %v748_v13, %v783_v56  ;;  %v659_v26 = vrot.slane %v658_v10, 1 }
 0x108   : > { %v534_v27 = vrot.slane %v533_v22, 2  ;;  %v662_v45 = vmax.f32 %v622_v18, %v661_v28  ;;  %v559_v18 = vsel %vm558_vm3, %v525_v3, %v557_v2  ;;  %v774_v30 = vmax.f32 %v772_v55, %v773_v12 }
 0x109   : > { %v785_v13 = vrot.slane %v784_v6, 2  ;;  %v660_v49 = vmax.f32 %v658_v10, %v659_v26  ;;  %v781_v55 = vrot.slane %v780_v40, 1 }
 0x10a   : > { %v535_v41 = vmax.f32 %v533_v22, %v534_v27  ;;  %v663_v63 = vrot.slane %v662_v45, 2  ;;  %v561_v22 = vsel %vm560_vm4, %v531_v5, %v559_v18  ;;  %v775_v52 = vrot.slane %v774_v30, 1  ;;  %v630_v5 = vld [vmem:[#allocation3] sm:$0xff] }
 0x10b   : > { %v492_v42 = vpop.f32.mrf.mxu3 }
 0x10c   : > { %v538_v46 = vrot.slane %v492_v42, 4  ;;  %v750_v47 = vpop.f32.mrf.mxu2  ;;  %v536_v60 = vrot.slane %v535_v41, 1  ;;  %v664_v15 = vmax.f32 %v662_v45, %v663_v63  ;;  %v786_v45 = vmax.f32 %v784_v6, %v785_v13 }
 0x10d   : > { %v625_v53 = vpop.f32.mrf.mxu1  ;;  %v789_v61 = vrot.slane %v750_v47, 4  ;;  %v776_v2 = vmax.f32 %v774_v30, %v775_v52 }
 0x10e   : > { %v539_v57 = vmax.f32 %v492_v42, %v538_v46  ;;  %v667_v58 = vrot.slane %v625_v53, 4  ;;  %v537_v36 = vmax.f32 %v535_v41, %v536_v60  ;;  %v665_v31 = vrot.slane %v664_v15, 1 }
 0x10f   : > { %v790_v11 = vmax.f32 %v750_v47, %v789_v61  ;;  %v687_v47 = vsel %vm552_vm0, %v1678_v35, %v1674_v33  ;;  %v787_v62 = vrot.slane %v786_v45, 1  ;;  %v770_v33 = vmax.f32 %v1680_v39, %v769_v48 }
 0x110   : > { %v540_v0 = vrot.slane %v539_v57, 2  ;;  %v668_v1 = vmax.f32 %v625_v53, %v667_v58  ;;  %v563_v27 = vsel %vm562_vm5, %v537_v36, %v561_v22  ;;  %v666_v53 = vmax.f32 %v664_v15, %v665_v31 }
 0x111   : > { %v791_v28 = vrot.slane %v790_v11, 2  ;;  %v688_v58 = vsel %vm554_vm1, %v648_v9, %v687_v47  ;;  %v788_v36 = vmax.f32 %v786_v45, %v787_v62 }
 0x112   : > { %v541_v7 = vmax.f32 %v539_v57, %v540_v0  ;;  %v669_v8 = vrot.slane %v668_v1, 2  ;;  %v689_v61 = vsel %vm556_vm2, %v654_v44, %v688_v58 }
 0x113   : > { %v792_v51 = vmax.f32 %v790_v11, %v791_v28  ;;  %v690_v35 = vsel %vm558_vm3, %v660_v49, %v689_v61 }
 0x114   : > { %v542_v16 = vrot.slane %v541_v7, 1  ;;  %v753_v17 = vpop.f32.mrf.mxu2  ;;  %v670_v20 = vmax.f32 %v668_v1, %v669_v8  ;;  %v691_v3 = vsel %vm560_vm4, %v666_v53, %v690_v35  ;;  %v782_v8 = vmax.f32 %v780_v40, %v781_v55 }
 0x115   : > { %v795_v21 = vrot.slane %v753_v17, 4  ;;  %v627_v50 = vpop.f32.mrf.mxu1  ;;  %v793_v0 = vrot.slane %v792_v51, 1 }
 0x116   : > { %v543_v24 = vmax.f32 %v541_v7, %v542_v16  ;;  %v673_v25 = vrot.slane %v627_v50, 4  ;;  %v671_v41 = vrot.slane %v670_v20, 1  ;;  %v764_v7 = vmax.f32 %v1676_v34, %v763_v43 }
 0x117   : > { %v796_v29 = vmax.f32 %v753_v17, %v795_v21  ;;  %v794_v12 = vmax.f32 %v792_v51, %v793_v0  ;;  %v758_v21 = vld [vmem:[#allocation4] sm:$0xff] }
 0x118   : > { %v565_v32 = vsel %vm564_vm6, %v543_v24, %v563_v27  ;;  %v674_v37 = vmax.f32 %v627_v50, %v673_v25  ;;  %v672_v59 = vmax.f32 %v670_v20, %v671_v41  ;;  %v815_v39 = vsel %vm552_vm0, %v770_v33, %v764_v7 }
 0x119   : > { %v567_v38 = vmax.f32 %v495_v23, %v565_v32  ;;  %v797_v42 = vrot.slane %v796_v29, 2  ;;  %v816_v16 = vsel %vm554_vm1, %v776_v2, %v815_v39 }
 0x11a   : > { %v675_v46 = vrot.slane %v674_v37, 2  ;;  %v692_v9 = vsel %vm562_vm5, %v672_v59, %v691_v3  ;;  %v817_v18 = vsel %vm556_vm2, %v782_v8, %v816_v16 }
 0x11b   : > { %568 = vst [vmem:[#allocation2] sm:$0xff] %v567_v38  ;;  %v798_v54 = vmax.f32 %v796_v29, %v797_v42  ;;  %v818_v34 = vsel %vm558_vm3, %v788_v36, %v817_v18 }
 0x11c   : > { %v676_v56 = vmax.f32 %v674_v37, %v675_v46  ;;  %v755_v57 = vpop.f32.mrf.mxu2  ;;  %v819_v20 = vsel %vm560_vm4, %v794_v12, %v818_v34 }
 0x11d   : > { %v801_v60 = vrot.slane %v755_v57, 4  ;;  %v799_v4 = vrot.slane %v798_v54, 1 }
 0x11e   : > { %v677_v63 = vrot.slane %v676_v56, 1 }
 0x11f   : > { %v802_v1 = vmax.f32 %v755_v57, %v801_v60  ;;  %v800_v17 = vmax.f32 %v798_v54, %v799_v4 }
 0x120   : > { %v678_v6 = vmax.f32 %v676_v56, %v677_v63 }
 0x121   : > { %v803_v10 = vrot.slane %v802_v1, 2  ;;  %v820_v22 = vsel %vm562_vm5, %v800_v17, %v819_v20 }
 0x122   : > { %v693_v11 = vsel %vm564_vm6, %v678_v6, %v692_v9 }
 0x123   : > { %v695_v14 = vmax.f32 %v630_v5, %v693_v11  ;;  %v804_v15 = vmax.f32 %v802_v1, %v803_v10 }
 0x125   : > { %696 = vst [vmem:[#allocation3] sm:$0xff] %v695_v14  ;;  %v805_v19 = vrot.slane %v804_v15, 1 }
 0x127   : > { %v806_v50 = vmax.f32 %v804_v15, %v805_v19 }
 0x128   : > { %828 = sbr.rel (%p1136_p2) target bundleno = 581 (0x245), region = 64 }
 0x129   : > { %v821_v13 = vsel %vm564_vm6, %v806_v50, %v820_v22 }
 0x12a   : > { %v823_v23 = vmax.f32 %v758_v21, %v821_v13 }
 0x12c   : > { %824 = vst [vmem:[#allocation4] sm:$0xff] %v823_v23 }
 0x12d   : > { %v1258_v24 = vld [vmem:[%s1742_s4] ss:$0 sm:$0xff]  ;;  %v835_v29 = vld [vmem:[#allocation3] sm:$0xff]  ;;  %v898_v6 = vlaneseq  ;;  %v1482_v12 = vmov 0.0  }
 0x12e   : > { %v830_v26 = vld [vmem:[#allocation2] sm:$0xff]  ;;  %v836_v32 = vadd.f32 %v1258_v24, %v835_v29 }
 0x12f   : > { %v834_v28 = vadd.f32 %v1258_v24, %v830_v26  ;;  %v899_v7 = vand.u32 127, %v898_v6 }
 0x130   : > { %v854_v37 = vmul.f32 %v836_v32, %v836_v32 }
 0x131   : > { %v839_v31 = vmul.f32 %v834_v28, %v834_v28  ;;  %vm900_vm0 = vcmp.eq.s32.totalorder %v899_v7, 0  ;;  %vm902_vm1 = vcmp.eq.s32.totalorder %v899_v7, 1  ;;  %vm904_vm3 = vcmp.eq.s32.totalorder %v899_v7, 2 }
 0x132   : > { %vm906_vm4 = vcmp.eq.s32.totalorder %v899_v7, 3 }
 0x133   : > { %v837_v25 = vld [vmem:[#allocation4] sm:$0xff]  ;;  %840 = vadd.xlane.f32.xlu0 %v839_v31 }
 0x134   : > { %v838_v27 = vadd.f32 %v1258_v24, %v837_v25 }
 0x136   : > { %v869_v30 = vmul.f32 %v838_v27, %v838_v27 }
 0x138   : > { %870 = vadd.xlane.f32.xlu1 %v869_v30 }
 0x13b   : > { %855 = vadd.xlane.f32.xlu0 %v854_v37 }
 0x1a6   : > { %v841_v38 = vpop.xlane.xlu0 %840 }
 0x1a7   : > { %v842_v42 = vmax.f32 %v841_v38, 1e-24 }
 0x1a9   : > { %vm849_vm10 = vweird.f32 %v842_v42 }
 0x1ab   : > { %v871_v40 = vpop.xlane.xlu1 %870 }
 0x1ac   : > { %v872_v41 = vmax.f32 %v871_v40, 1e-24 }
 0x1ae   : > { %1259 = vrsqrt.f32 %v872_v41  ;;  %v856_v43 = vpop.xlane.xlu0 %855  ;;  %vm879_vm7 = vweird.f32 %v872_v41 }
 0x1af   : > { %1261 = vrsqrt.f32 %v842_v42  ;;  %v857_v45 = vmax.f32 %v856_v43, 1e-24 }
 0x1b1   : > { %1263 = vrsqrt.f32 %v857_v45  ;;  %vm864_vm14 = vweird.f32 %v857_v45 }
 0x1b4   : > { %v1260_v44 = vpop.eup %1259 }
 0x1b5   : > { %v1262_v46 = vpop.eup %1261  ;;  %v874_v47 = vmul.f32 %v1260_v44, %v872_v41  ;;  %vm880_vm8 = vweird.f32 %v1260_v44 }
 0x1b6   : > { %v844_v48 = vmul.f32 %v1262_v46, %v842_v42  ;;  %vm850_vm9 = vweird.f32 %v1262_v46  ;;  %vm881_vm11 = vmor %vm879_vm7, %vm880_vm8 }
 0x1b7   : > { %v875_v49 = vmul.f32 %v1260_v44, %v874_v47  ;;  %v1264_v56 = vpop.eup %1263  ;;  %vm851_vm12 = vmor %vm849_vm10, %vm850_vm9 }
 0x1b8   : > { %v845_v51 = vmul.f32 %v1262_v46, %v844_v48  ;;  %v859_v58 = vmul.f32 %v1264_v56, %v857_v45  ;;  %vm865_vm13 = vweird.f32 %v1264_v56 }
 0x1b9   : > { %v876_v52 = vmul.f32 0.5, %v875_v49  ;;  %vm866_vm15 = vmor %vm864_vm14, %vm865_vm13 }
 0x1ba   : > { %v846_v53 = vmul.f32 0.5, %v845_v51  ;;  %v860_v60 = vmul.f32 %v1264_v56, %v859_v58 }
 0x1bb   : > { %v877_v54 = vsub.f32 1.5, %v876_v52 }
 0x1bc   : > { %v847_v57 = vsub.f32 1.5, %v846_v53  ;;  %v861_v33 = vmul.f32 0.5, %v860_v60 }
 0x1bd   : > { %v878_v55 = vmul.f32 %v1260_v44, %v877_v54 }
 0x1be   : > { %v848_v59 = vmul.f32 %v1262_v46, %v847_v57  ;;  %v862_v0 = vsub.f32 1.5, %v861_v33 }
 0x1bf   : > { %v882_v61 = vsel %vm881_vm11, %v1260_v44, %v878_v55 }
 0x1c0   : > { %v852_v62 = vsel %vm851_vm12, %v1262_v46, %v848_v59  ;;  %v883_v63 = vmul.f32 %v882_v61, %v838_v27  ;;  %v863_v2 = vmul.f32 %v1264_v56, %v862_v0 }
 0x1c1   : > { %v853_v35 = vmul.f32 %v852_v62, %v834_v28 }
 0x1c2   : > { %v867_v3 = vsel %vm866_vm15, %v1264_v56, %v863_v2 }
 0x1c3   : > { %v888_v1 = vmul.f32 %v883_v63, %v853_v35  ;;  %v868_v4 = vmul.f32 %v867_v3, %v836_v32 }
 0x1c5   : > { %889 = vadd.xlane.f32.xlu2 %v888_v1  ;;  %v884_v5 = vmul.f32 %v868_v4, %v853_v35 }
 0x1c7   : > { %885 = vadd.xlane.f32.xlu1 %v884_v5 }
 0x238   : > { %v890_v8 = vpop.xlane.xlu2 %889 }
 0x239   : > { %v891_v10 = vsub.f32 1.0, %v890_v8 }
 0x23a   : > { %v886_v9 = vpop.xlane.xlu1 %885 }
 0x23b   : > { %v887_v36 = vsub.f32 1.0, %v886_v9 }
 0x23d   : > { %vm892_vm2 = vcmp.gt.f32.partialorder %v891_v10, %v887_v36  ;;  %v895_v11 = vsub.f32 %v887_v36, %v891_v10  ;;  %v901_v39 = vsel %vm900_vm0, %v887_v36, 0.0 }
 0x23e   : > { %v1137_v14 = vsel %vm892_vm2, 1.0, %v1482_v12  ;;  %v903_v16 = vsel %vm902_vm1, %v891_v10, %v901_v39 }
 0x23f   : > { %v896_v15 = vadd.f32 0.1, %v895_v11  ;;  %v905_v18 = vsel %vm904_vm3, %v1137_v14, %v903_v16 }
 0x241   : > { %v897_v17 = vmax.f32 %v896_v15, 0.0 }
 0x243   : > { %v907_v19 = vsel %vm906_vm4, %v897_v17, %v905_v18 }
 0x244   : > { %908 = vst [vmem:[#allocation13] sm:$0xff] %v907_v19 }
 0x245 PF: > { %p1201_p3 = scmp.eq.s32.totalorder %s1584_s25, 2  ;;  %s919_s16 = sshll.u32 %s1743_s5, 4  ;;  %s920_s16 = int_to_ptr.hbm [resolvable:$true] %s919_s16 }
 0x246   : > { %s1483_s17 = smov [#allocation13]  }
 0x247   : > { %s917_s26 = sshll.u32 %s1483_s17, 4  ;;  %s918_s26 = int_to_ptr.vmem [resolvable:$true] %s917_s26 }
 0x248   : > { %1181 = dma.vmem_to_hbm [thread:$0]  (%p1201_p3), %s918_s26, 128, %s920_s16, [#allocation7]  }
 0x249   : > { %1450 = dma.done.wait (%p1201_p3), [#allocation7], 128  }
 0x24a   : > { %1452 = vsyncadd (%p1201_p3), [#allocation7], 4294967168 }
 0x24b PF: > { %s23_s23 = sadd.s32 1, %s1475_s23   ;;  %s1760_s25 = sld [smem:[#allocation18_spill]] }
 0x24c   : > { %p20_p4 = scmp.ge.s32.totalorder %s23_s23, 5   ;;  %s1761_s18 = smov %s1459_s19 }
 0x24d   : > { %s1762_s19 = smov %s1463_s20  ;;  %s1763_s20 = smov %s1559_s29 }
 0x24e   : > { %s1764_s21 = smov %s1471_s22  ;;  %22 = sbr.rel (!%p20_p4) target bundleno = 12 (0xc), region = 114 }
 0x251   : > { %s1765_s22 = smov %s1760_s25 }
 0x253   :  { %933 = vsyncpa [#allocation6], 1 }
 0x254   :  { %935 = vsyncpa [#allocation6 + $0x1], 1 }
 0x255   :  { %936 = vsyncpa [#allocation9], 1 }
 0x256   :  { %938 = vsyncpa [#allocation9 + $0x1], 1 }
 0x257   :  { %939 = vsyncpa [#allocation12], 1 }
 0x258   :  { %940 = vsyncpa [#allocation7], 1 }
 0x259   :  { %942 = vsyncpa [#allocation7 + $0x1], 1 }

</bundles_post_ra>
